<compile_context>
chip_gen: v7x
topology: tpu7x:2x2x1
jax: 0.10.0
libtpu: 0.0.40
codegen_flags: <defaults>
</compile_context>

<pallas_src>
import functools

import jax
import jax.numpy as jnp
from jax.experimental import pallas as pl
from jax.experimental.pallas import tpu as pltpu


def _pooling_kernel(inv_ref, mu_ref, md_ref, ml_ref, mr_ref, x_ref, o_ref,
                    *, H, W, C, compute_dtype):
    # x_ref / o_ref: (Bt, H, W*C) in the model dtype.
    # inv/mask refs: (H, W*C) in the compute dtype (loaded into VMEM once).
    WC = W * C
    x = x_ref[...]
    xc = x.astype(compute_dtype)

    # --- Horizontal 3-tap sum: lane rolls by +/-C (XLU); wrapped columns are
    # zeroed by precomputed masks (plain VPU multiplies).
    hsum = xc
    if W > 1:
        left = pltpu.roll(xc, shift=C, axis=2) * ml_ref[...]         # w-1 tap
        right = pltpu.roll(xc, shift=WC - C, axis=2) * mr_ref[...]   # w+1 tap
        hsum = hsum + left + right

    # --- Vertical 3-tap sum: sublane rolls by +/-1; wrapped rows zeroed.
    total = hsum
    if H > 1:
        up = pltpu.roll(hsum, shift=1, axis=1) * mu_ref[...]         # h-1 tap
        down = pltpu.roll(hsum, shift=H - 1, axis=1) * md_ref[...]   # h+1 tap
        total = total + up + down

    # count_include_pad=False -> multiply by reciprocal valid-tap count, then
    # subtract the residual input. Exactly one store of the final result.
    y = total * inv_ref[...] - xc
    o_ref[...] = y.astype(o_ref.dtype)


def _choose_batch_block(B, slab_bytes):
    TARGET = 1 << 20      # aim for ~1 MiB moved per grid step (near HBM roofline)
    VMEM_CAP = 6 << 20    # keep double-buffered in+out + temps well inside VMEM
    bt = max(1, min(B, TARGET // max(slab_bytes, 1)))
    bt = min(bt, max(1, VMEM_CAP // max(slab_bytes, 1)))
    if bt >= B and B >= 2:
        bt = B // 2        # keep >=2 parallel grid steps (v7x has 2 TensorCores)
    bt = max(1, min(bt, B))
    while B % bt:          # make bt divide B
        bt -= 1
    return bt


def pooling(x, *, compute_dtype=jnp.float32):
    """x: (B, H, W, C). Returns avg_pool3x3(x) - x (count_include_pad=False)."""
    B, H, W, C = x.shape
    WC = W * C
    cdt = jnp.dtype(compute_dtype)

    # ---- host-side constant tables (DMA'd into VMEM once, reused every step)
    h = jnp.arange(H)
    w = jnp.arange(W)
    rows_valid = jnp.minimum(h + 1, H - 1) - jnp.maximum(h - 1, 0) + 1   # (H,)
    cols_valid = jnp.minimum(w + 1, W - 1) - jnp.maximum(w - 1, 0) + 1   # (W,)
    count = (rows_valid[:, None] * cols_valid[None, :]).astype(jnp.float32)
    inv = jnp.broadcast_to((1.0 / count)[:, :, None], (H, W, C))
    inv = inv.reshape(H, WC).astype(cdt)                                 # (H, W*C)

    mu = jnp.broadcast_to((h >= 1)[:, None], (H, WC)).astype(cdt)        # h-1 valid
    md = jnp.broadcast_to((h <= H - 2)[:, None], (H, WC)).astype(cdt)    # h+1 valid
    ml = jnp.broadcast_to(jnp.repeat(w >= 1, C)[None, :], (H, WC)).astype(cdt)
    mr = jnp.broadcast_to(jnp.repeat(w <= W - 2, C)[None, :], (H, WC)).astype(cdt)

    # ---- lane-dense layout + batch blocking
    x2 = x.reshape(B, H, WC)              # free: collapses the two minor dims
    slab_bytes = H * WC * x.dtype.itemsize
    bt = _choose_batch_block(B, slab_bytes)
    grid = (B // bt,)

    const_spec = pl.BlockSpec((H, WC), lambda i: (0, 0))
    data_spec = pl.BlockSpec((bt, H, WC), lambda i: (i, 0, 0))

    const_bytes = 5 * H * WC * cdt.itemsize
    block_bytes = bt * H * WC * x.dtype.itemsize
    vmem_est = 2 * const_bytes + 4 * block_bytes + 6 * bt * H * WC * cdt.itemsize
    vmem_limit = int(min(48 << 20, max(16 << 20, vmem_est)))

    kernel = functools.partial(_pooling_kernel, H=H, W=W, C=C, compute_dtype=cdt)

    out = pl.pallas_call(
        kernel,
        out_shape=jax.ShapeDtypeStruct((B, H, WC), x.dtype),
        grid_spec=pltpu.PrefetchScalarGridSpec(
            num_scalar_prefetch=0,
            grid=grid,
            in_specs=[const_spec, const_spec, const_spec, const_spec, const_spec,
                      data_spec],
            out_specs=data_spec,
        ),
        compiler_params=pltpu.CompilerParams(
            dimension_semantics=("parallel",),
            vmem_limit_bytes=vmem_limit),
        cost_estimate=pl.CostEstimate(
            flops=10 * B * H * WC,
            transcendentals=0,
            bytes_accessed=2 * B * H * WC * x.dtype.itemsize + const_bytes),
    )(inv, mu, md, ml, mr, x2)
    return out.reshape(B, H, W, C)


def _pooling_ref(x):
    """Pure-JAX reference of the PyTorch module for verification."""
    B, H, W, C = x.shape
    xp = jnp.pad(x.astype(jnp.float32), ((0, 0), (1, 1), (1, 1), (0, 0)))
    total = jnp.zeros((B, H, W, C), jnp.float32)
    for dh in range(3):
        for dw in range(3):
            total = total + xp[:, dh:dh + H, dw:dw + W, :]
    h = jnp.arange(H)
    w = jnp.arange(W)
    rv = jnp.minimum(h + 1, H - 1) - jnp.maximum(h - 1, 0) + 1
    cv = jnp.minimum(w + 1, W - 1) - jnp.maximum(w - 1, 0) + 1
    count = (rv[:, None] * cv[None, :]).astype(jnp.float32)[None, :, :, None]
    return (total / count - x.astype(jnp.float32)).astype(x.dtype)


if __name__ == "__main__":
    key = jax.random.PRNGKey(0)
    B, H, W, C = 2, 16, 16, 8
    x = jax.random.normal(key, (B, H, W, C), dtype=jnp.float32)

    out = pooling(x)
    jax.block_until_ready(out)

    ref = _pooling_ref(x)
    assert out.shape == (B, H, W, C)
    assert jnp.allclose(out, ref, atol=1e-5, rtol=1e-5)

    print("KERNEL_OK")
</pallas_src>

<mosaic_0001>
module attributes {stable_mosaic.version = 11 : i64} {
  func.func @_pooling_kernel(%arg0: i32, %arg1: memref<16x128xf32, #tpu.memory_space<vmem>>, %arg2: memref<16x128xf32, #tpu.memory_space<vmem>>, %arg3: memref<16x128xf32, #tpu.memory_space<vmem>>, %arg4: memref<16x128xf32, #tpu.memory_space<vmem>>, %arg5: memref<16x128xf32, #tpu.memory_space<vmem>>, %arg6: memref<1x16x128xf32, #tpu.memory_space<vmem>>, %arg7: memref<1x16x128xf32, #tpu.memory_space<vmem>>) attributes {dimension_semantics = [#tpu.dimension_semantics<parallel>], iteration_bounds = array<i64: 2>, scalar_prefetch = 0 : i64, scratch_operands = 0 : i64, tpu.core_type = #tpu.core_type<tc>, window_params = [{pipeline_mode = #tpu.pipeline_mode<synchronous>, transform_indices = @transform_0, window_bounds = array<i64: 16, 128>}, {pipeline_mode = #tpu.pipeline_mode<synchronous>, transform_indices = @transform_1, window_bounds = array<i64: 16, 128>}, {pipeline_mode = #tpu.pipeline_mode<synchronous>, transform_indices = @transform_2, window_bounds = array<i64: 16, 128>}, {pipeline_mode = #tpu.pipeline_mode<synchronous>, transform_indices = @transform_3, window_bounds = array<i64: 16, 128>}, {pipeline_mode = #tpu.pipeline_mode<synchronous>, transform_indices = @transform_4, window_bounds = array<i64: 16, 128>}, {transform_indices = @transform_5, window_bounds = array<i64: 1, 16, 128>}, {transform_indices = @transform_6, window_bounds = array<i64: 1, 16, 128>}]} {
    %c0 = arith.constant 0 : index
    %c0_0 = arith.constant 0 : index
    %c0_1 = arith.constant 0 : index
    %0 = vector.load %arg6[%c0, %c0_0, %c0_1] : memref<1x16x128xf32, #tpu.memory_space<vmem>>, vector<1x16x128xf32>
    %c8_i32 = arith.constant 8 : i32
    %1 = tpu.dynamic_rotate %0 by %c8_i32 dim 2 : vector<1x16x128xf32>, i32 -> vector<1x16x128xf32>
    %c0_2 = arith.constant 0 : index
    %c0_3 = arith.constant 0 : index
    %2 = vector.load %arg4[%c0_2, %c0_3] : memref<16x128xf32, #tpu.memory_space<vmem>>, vector<16x128xf32>
    %3 = vector.shape_cast %2 : vector<16x128xf32> to vector<1x16x128xf32>
    %4 = arith.mulf %1, %3 : vector<1x16x128xf32>
    %c120_i32 = arith.constant 120 : i32
    %5 = tpu.dynamic_rotate %0 by %c120_i32 dim 2 : vector<1x16x128xf32>, i32 -> vector<1x16x128xf32>
    %c0_4 = arith.constant 0 : index
    %c0_5 = arith.constant 0 : index
    %6 = vector.load %arg5[%c0_4, %c0_5] : memref<16x128xf32, #tpu.memory_space<vmem>>, vector<16x128xf32>
    %7 = vector.shape_cast %6 : vector<16x128xf32> to vector<1x16x128xf32>
    %8 = arith.mulf %5, %7 : vector<1x16x128xf32>
    %9 = arith.addf %0, %4 : vector<1x16x128xf32>
    %10 = arith.addf %9, %8 : vector<1x16x128xf32>
    %c1_i32 = arith.constant 1 : i32
    %11 = tpu.dynamic_rotate %10 by %c1_i32 dim 1 : vector<1x16x128xf32>, i32 -> vector<1x16x128xf32>
    %c0_6 = arith.constant 0 : index
    %c0_7 = arith.constant 0 : index
    %12 = vector.load %arg2[%c0_6, %c0_7] : memref<16x128xf32, #tpu.memory_space<vmem>>, vector<16x128xf32>
    %13 = vector.shape_cast %12 : vector<16x128xf32> to vector<1x16x128xf32>
    %14 = arith.mulf %11, %13 : vector<1x16x128xf32>
    %c15_i32 = arith.constant 15 : i32
    %15 = tpu.dynamic_rotate %10 by %c15_i32 dim 1 : vector<1x16x128xf32>, i32 -> vector<1x16x128xf32>
    %c0_8 = arith.constant 0 : index
    %c0_9 = arith.constant 0 : index
    %16 = vector.load %arg3[%c0_8, %c0_9] : memref<16x128xf32, #tpu.memory_space<vmem>>, vector<16x128xf32>
    %17 = vector.shape_cast %16 : vector<16x128xf32> to vector<1x16x128xf32>
    %18 = arith.mulf %15, %17 : vector<1x16x128xf32>
    %19 = arith.addf %10, %14 : vector<1x16x128xf32>
    %20 = arith.addf %19, %18 : vector<1x16x128xf32>
    %c0_10 = arith.constant 0 : index
    %c0_11 = arith.constant 0 : index
    %21 = vector.load %arg1[%c0_10, %c0_11] : memref<16x128xf32, #tpu.memory_space<vmem>>, vector<16x128xf32>
    %22 = vector.shape_cast %21 : vector<16x128xf32> to vector<1x16x128xf32>
    %23 = arith.mulf %20, %22 : vector<1x16x128xf32>
    %24 = arith.subf %23, %0 : vector<1x16x128xf32>
    %c0_12 = arith.constant 0 : index
    %c0_13 = arith.constant 0 : index
    %c0_14 = arith.constant 0 : index
    %25 = vector.load %arg7[%c0_12, %c0_13, %c0_14] : memref<1x16x128xf32, #tpu.memory_space<vmem>>, vector<1x16x128xf32>
    tpu.vector_store %arg7[%c0_12, %c0_13, %c0_14], %24 {strides = array<i32>} : memref<1x16x128xf32, #tpu.memory_space<vmem>>, vector<1x16x128xf32>,
    return
  }
  func.func @transform_0(%arg0: i32) -> (i32, i32) {
    %c0_i32 = arith.constant 0 : i32
    %c0_i32_0 = arith.constant 0 : i32
    %c0_i32_1 = arith.constant 0 : i32
    return %c0_i32, %c0_i32_0 : i32, i32
  }
  func.func @transform_1(%arg0: i32) -> (i32, i32) {
    %c0_i32 = arith.constant 0 : i32
    %c0_i32_0 = arith.constant 0 : i32
    %c0_i32_1 = arith.constant 0 : i32
    return %c0_i32, %c0_i32_0 : i32, i32
  }
  func.func @transform_2(%arg0: i32) -> (i32, i32) {
    %c0_i32 = arith.constant 0 : i32
    %c0_i32_0 = arith.constant 0 : i32
    %c0_i32_1 = arith.constant 0 : i32
    return %c0_i32, %c0_i32_0 : i32, i32
  }
  func.func @transform_3(%arg0: i32) -> (i32, i32) {
    %c0_i32 = arith.constant 0 : i32
    %c0_i32_0 = arith.constant 0 : i32
    %c0_i32_1 = arith.constant 0 : i32
    return %c0_i32, %c0_i32_0 : i32, i32
  }
  func.func @transform_4(%arg0: i32) -> (i32, i32) {
    %c0_i32 = arith.constant 0 : i32
    %c0_i32_0 = arith.constant 0 : i32
    %c0_i32_1 = arith.constant 0 : i32
    return %c0_i32, %c0_i32_0 : i32, i32
  }
  func.func @transform_5(%arg0: i32) -> (i32, i32, i32) {
    %c0_i32 = arith.constant 0 : i32
    %c0_i32_0 = arith.constant 0 : i32
    %c0_i32_1 = arith.constant 0 : i32
    return %arg0, %c0_i32, %c0_i32_0 : i32, i32, i32
  }
  func.func @transform_6(%arg0: i32) -> (i32, i32, i32) {
    %c0_i32 = arith.constant 0 : i32
    %c0_i32_0 = arith.constant 0 : i32
    %c0_i32_1 = arith.constant 0 : i32
    return %arg0, %c0_i32, %c0_i32_0 : i32, i32, i32
  }
}

</mosaic_0001>

<bundles_post_ra>
// kernel: tpu_custom_call.1
= control target key start
LH: loop header
LB: loop body
LE: loop exit
PB: predicated region body
PF: predicated region fallthrough
CT: control target
= control target key end

     0   :  { %11 = vsyncpa [#allocation3], 0  ;;  %s1285_s0 = inlined_call_operand.hbm [shape: f32[16,128], index: 0, kind: input, shape index: {}]   ;;  %s1286_s1 = inlined_call_operand.hbm [shape: f32[16,128], index: 1, kind: input, shape index: {}]   ;;  %s1287_s2 = inlined_call_operand.hbm [shape: f32[16,128], index: 2, kind: input, shape index: {}]   ;;  %s1288_s3 = inlined_call_operand.hbm [shape: f32[16,128], index: 3, kind: input, shape index: {}]   ;;  %s1289_s4 = inlined_call_operand.hbm [shape: f32[16,128], index: 4, kind: input, shape index: {}]   ;;  %s1290_s5 = inlined_call_operand.hbm [shape: f32[2,16,128], index: 5, kind: input, shape index: {}]   ;;  %s1291_s6 = inlined_call_operand.hbm [shape: f32[2,16,128], index: 6, kind: output, shape index: {}]  }
   0x1   :  { %12 = vsyncpa [#allocation6], 0 }
   0x2   :  { %13 = vsyncpa [#allocation9], 0 }
   0x3   :  { %14 = vsyncpa [#allocation12], 0 }
   0x4   :  { %16 = vsyncpa [#allocation12 + $0x1], 0 }
   0x5   :  { %17 = vsyncpa [#allocation4], 0 }
   0x6   :  { %19 = vsyncpa [#allocation4 + $0x1], 0  ;;  %s959_s21 = smov 0   ;;  %s961_s22 = smov 0  }
   0x7   :  { %s963_s23 = smov 0   ;;  %s965_s24 = smov 0  }
   0x8 LB: > { %s980_s25 = sadd.s32 4294967295, %s910_s24   ;;  %p535_p0 = scmp.ge.s32.totalorder %s910_s24, 1  ;;  %s910_s24 = sphi %s965_s24, %s1316_s24   ;;  %s906_s23 = sphi %s963_s23, %s1315_s23   ;;  %s902_s22 = sphi %s961_s22, %s1314_s22   ;;  %s898_s21 = sphi %s959_s21, %s1313_s21  }
   0x9   : > { %p1292_p1 = scmp.eq.s32.totalorder %s980_s25, 0  ;;  %p187_p2 = scmp.lt.s32.totalorder %s910_s24, 3 }
   0xa   : > { %s912_s27 = smov [#allocation5]   ;;  %s913_s29 = smov [#allocation8]  }
   0xb   : > { %p985_p3 = pnand %p535_p0, %p187_p2  ;;  %s212_s28 = sshll.u32 %s912_s27, 4  ;;  %s989_s28 = int_to_ptr.vmem [resolvable:$true] %s212_s28 }
   0xc   : > { %s238_s30 = sshll.u32 %s913_s29, 4  ;;  %s914_s8 = smov [#allocation2]   ;;  %s1000_s30 = int_to_ptr.vmem [resolvable:$true] %s238_s30 }
   0xd   : > { %s1295_s26 = scalar_select %p985_p3, 1, 0 }
   0xe   : > { %p584_p5 = pneg %p985_p3  ;;  %s199_s9 = sshll.u32 %s914_s8, 4  ;;  %s1002_s9 = int_to_ptr.vmem [resolvable:$true] %s199_s9 }
   0xf   : > { %s662_s12 = scalar_lea.hbm %s1286_s1, 256 }
  0x10   : > { %p996_p6 = pnand %p584_p5, %p1292_p1  ;;  %p663_p7 = scmp.ne.s32.totalorder %s1286_s1, %s662_s12 }
  0x11   : > { %p669_p11 = scmp.lt.u32.totalorder %s662_s12, %s1286_s1 }
  0x12   : > { %p1012_p8 = pneg %p996_p6 }
  0x14   : > { %p665_p9 = pnand %p1012_p8, %p663_p7 }
  0x16   : > { %p666_p10 = pneg %p665_p9 }
  0x18   : > { %p671_p12 = pnand %p669_p11, %p666_p10 }
  0x1a   : > { %674 = shalt.err (!%p671_p12)
}
  0x1b   : > { %s675_s18 = scalar_lea.vmem %s989_s28, 256  ;;  %p683_p5 = scmp.lt.s32.totalorder %s989_s28, %s989_s28 }
  0x1c   : > { %p676_p13 = scmp.ne.s32.totalorder %s989_s28, %s675_s18  ;;  %p684_p4 = scmp.lt.s32.totalorder %s675_s18, %s675_s18 }
  0x1e   : > { %p678_p0 = pnand %p676_p13, %p1012_p8  ;;  %p685_p7 = por %p684_p4, %p683_p5 }
  0x20   : > { %p679_p2 = pneg %p678_p0 }
  0x22   : > { %p686_p9 = pnand %p685_p7, %p679_p2 }
  0x24   : > { %689 = shalt.err (!%p686_p9)
}
  0x25   : > { %s915_s19 = smov 128   ;;  %s916_s20 = smov 8  }
  0x26   : > { %590 = dma.hbm_to_vmem [thread:$0]  (!%p996_p6), %s1286_s1, 256, %s989_s28, [#allocation6], %s915_s19, %s915_s19, %s916_s20  }
  0x27   : > { %s690_s11 = scalar_lea.hbm %s1288_s3, 256 }
  0x28   : > { %p691_p4 = scmp.ne.s32.totalorder %s1288_s3, %s690_s11  ;;  %p697_p12 = scmp.lt.u32.totalorder %s690_s11, %s1288_s3 }
  0x2a   : > { %p693_p10 = pnand %p691_p4, %p1012_p8 }
  0x2c   : > { %p694_p11 = pneg %p693_p10 }
  0x2e   : > { %p699_p13 = pnand %p697_p12, %p694_p11 }
  0x30   : > { %702 = shalt.err (!%p699_p13)
}
  0x31   : > { %s703_s28 = scalar_lea.vmem %s1000_s30, 256  ;;  %p711_p7 = scmp.lt.s32.totalorder %s1000_s30, %s1000_s30 }
  0x32   : > { %p704_p0 = scmp.ne.s32.totalorder %s1000_s30, %s703_s28  ;;  %p712_p9 = scmp.lt.s32.totalorder %s703_s28, %s703_s28 }
  0x34   : > { %p706_p2 = pnand %p704_p0, %p1012_p8  ;;  %p713_p4 = por %p712_p9, %p711_p7 }
  0x36   : > { %p707_p5 = pneg %p706_p2 }
  0x38   : > { %p714_p10 = pnand %p713_p4, %p707_p5 }
  0x3a   : > { %717 = shalt.err (!%p714_p10)
}
  0x3b   : > { %596 = dma.hbm_to_vmem [thread:$0]  (!%p996_p6), %s1288_s3, 256, %s1000_s30, [#allocation9], %s915_s19, %s915_s19, %s916_s20  }
  0x3c   : > { %s718_s8 = scalar_lea.hbm %s1285_s0, 256 }
  0x3d   : > { %p719_p11 = scmp.ne.s32.totalorder %s1285_s0, %s718_s8  ;;  %p725_p0 = scmp.lt.u32.totalorder %s718_s8, %s1285_s0 }
  0x3f   : > { %p721_p12 = pnand %p719_p11, %p1012_p8 }
  0x41   : > { %p722_p13 = pneg %p721_p12 }
  0x43   : > { %p727_p2 = pnand %p725_p0, %p722_p13 }
  0x45   : > { %730 = shalt.err (!%p727_p2)
}
  0x46   : > { %s731_s30 = scalar_lea.vmem %s1002_s9, 256  ;;  %p739_p4 = scmp.lt.s32.totalorder %s1002_s9, %s1002_s9 }
  0x47   : > { %p732_p5 = scmp.ne.s32.totalorder %s1002_s9, %s731_s30  ;;  %p740_p10 = scmp.lt.s32.totalorder %s731_s30, %s731_s30 }
  0x49   : > { %p734_p7 = pnand %p732_p5, %p1012_p8  ;;  %p741_p11 = por %p740_p10, %p739_p4 }
  0x4b   : > { %p735_p9 = pneg %p734_p7 }
  0x4d   : > { %p742_p12 = pnand %p741_p11, %p735_p9 }
  0x4f   : > { %745 = shalt.err (!%p742_p12)
}
  0x50   : > { %587 = dma.hbm_to_vmem [thread:$0]  (!%p996_p6), %s1285_s0, 256, %s1002_s9, [#allocation3], %s915_s19, %s915_s19, %s916_s20  }
  0x51   : > { %s917_s28 = smov [#allocation7]   ;;  %s918_s18 = smov [#allocation10]  }
  0x52   : > { %s225_s17 = sshll.u32 %s917_s28, 4  ;;  %s251_s27 = sshll.u32 %s918_s18, 4  ;;  %s226_s17 = int_to_ptr.vmem [resolvable:$true] %s225_s17  ;;  %s252_s27 = int_to_ptr.vmem [resolvable:$true] %s251_s27 }
  0x53   : > { %s746_s10 = scalar_lea.hbm %s1287_s2, 256 }
  0x54   : > { %p747_p13 = scmp.ne.s32.totalorder %s1287_s2, %s746_s10  ;;  %p753_p5 = scmp.lt.u32.totalorder %s746_s10, %s1287_s2 }
  0x56   : > { %p749_p0 = pnand %p747_p13, %p1012_p8 }
  0x58   : > { %p750_p2 = pneg %p749_p0 }
  0x5a   : > { %p755_p7 = pnand %p753_p5, %p750_p2 }
  0x5c   : > { %758 = shalt.err (!%p755_p7)
}
  0x5d   : > { %s759_s9 = scalar_lea.vmem %s226_s17, 256  ;;  %p767_p11 = scmp.lt.s32.totalorder %s226_s17, %s226_s17 }
  0x5e   : > { %p760_p9 = scmp.ne.s32.totalorder %s226_s17, %s759_s9  ;;  %p768_p12 = scmp.lt.s32.totalorder %s759_s9, %s759_s9 }
  0x60   : > { %p762_p4 = pnand %p760_p9, %p1012_p8  ;;  %p769_p1 = por %p768_p12, %p767_p11 }
  0x62   : > { %p763_p10 = pneg %p762_p4 }
  0x64   : > { %p770_p3 = pnand %p769_p1, %p763_p10 }
  0x66   : > { %773 = shalt.err (!%p770_p3)
}
  0x67   : > { %593 = dma.hbm_to_vmem [thread:$0]  (!%p996_p6), %s1287_s2, 256, %s226_s17, [#allocation6], %s915_s19, %s915_s19, %s916_s20  }
  0x68   : > { %s774_s29 = scalar_lea.hbm %s1289_s4, 256 }
  0x69   : > { %p775_p1 = scmp.ne.s32.totalorder %s1289_s4, %s774_s29  ;;  %p781_p0 = scmp.lt.u32.totalorder %s774_s29, %s1289_s4 }
  0x6b   : > { %p777_p3 = pnand %p775_p1, %p1012_p8 }
  0x6d   : > { %p778_p13 = pneg %p777_p3 }
  0x6f   : > { %p783_p2 = pnand %p781_p0, %p778_p13 }
  0x71   : > { %786 = shalt.err (!%p783_p2)
}
  0x72   : > { %s787_s13 = scalar_lea.vmem %s252_s27, 256  ;;  %p795_p4 = scmp.lt.s32.totalorder %s252_s27, %s252_s27 }
  0x73   : > { %p788_p5 = scmp.ne.s32.totalorder %s252_s27, %s787_s13  ;;  %p796_p10 = scmp.lt.s32.totalorder %s787_s13, %s787_s13 }
  0x75   : > { %p790_p7 = pnand %p788_p5, %p1012_p8  ;;  %p797_p11 = por %p796_p10, %p795_p4 }
  0x77   : > { %p791_p9 = pneg %p790_p7 }
  0x79   : > { %p798_p12 = pnand %p797_p11, %p791_p9 }
  0x7b   : > { %801 = shalt.err (!%p798_p12)
}
  0x7c   : > { %599 = dma.hbm_to_vmem [thread:$0]  (!%p996_p6), %s1289_s4, 256, %s252_s27, [#allocation9], %s915_s19, %s915_s19, %s916_s20  }
  0x7d   : > { %s534_s7 = sadd.s32 4294967294, %s910_s24   ;;  %s1132_s15 = sadd.s32 1, %s910_s24  }
  0x7e   : > { %s137_s9 = sadd.s32 1, %s906_s23  ;;  %s134_s14 = ssub.s32 %s910_s24, %s1132_s15 }
  0x7f   : > { %p144_p8 = scmp.ne.s32.totalorder %s906_s23, %s902_s22  ;;  %p135_p1 = scmp.eq.s32.totalorder %s134_s14, 0 }
  0x80   : > { %p145_p3 = scmp.eq.s32.totalorder %s910_s24, 0  ;;  %p150_p13 = scmp.ne.s32.totalorder %s902_s22, %s898_s21 }
  0x81   : > { %p174_p0 = scmp.eq.s32.totalorder %s980_s25, 1  ;;  %p1298_p5 = scmp.eq.s32.totalorder %s980_s25, 0 }
  0x82   : > { %s1144_s16 = scalar_select %p135_p1, %s906_s23, %s137_s9  }
  0x83   : > { %p146_p2 = por %p145_p3, %p144_p8  ;;  %p1148_p7 = por %p1298_p5, %p150_p13 }
  0x84   : > { %p1152_p6 = por %p174_p0, %p144_p8  ;;  %p180_p9 = scmp.eq.s32.totalorder %s534_s7, 1 }
  0x85   : > { %p613_p4 = scmp.lt.s32.totalorder %s910_s24, 2  ;;  %s265_s18 = sand.u32 1, %s906_s23  }
  0x86   : > { %s1300_s27 = scalar_select %p1152_p6, 1, 0 }
  0x87   : > { %p1158_p10 = por %p180_p9, %p150_p13  ;;  %s542_s8 = sshll.u32 %s265_s18, 4 }
  0x88   : > { %s558_s10 = sshll.u32 %s910_s24, 8  ;;  %s269_s17 = scalar_lea.vmem [#allocation11], %s542_s8 }
  0x89   : > { %s1301_s29 = scalar_select %p1158_p10, 1, 0 }
  0x8a   : > { %s1166_s13 = scalar_lea.hbm %s1290_s5, %s558_s10  ;;  %s276_s30 = sshll.u32 %s269_s17, 4  ;;  %s1172_s30 = int_to_ptr.vmem [resolvable:$true] %s276_s30 }
  0x8b   : > { %p1168_p11 = pnand %p613_p4, %p146_p2  ;;  %s1174_s9 = scalar_lea.sflag [#allocation12], %s265_s18 }
  0x8c   : > { %s802_s14 = scalar_lea.hbm %s1166_s13, 256  ;;  %s807_s11 = scalar_lea.hbm %s1290_s5, 512 }
  0x8d   : > { %p803_p12 = scmp.ne.s32.totalorder %s1166_s13, %s802_s14  ;;  %p804_p8 = pneg %p1168_p11 }
  0x8e   : > { %p808_p13 = scmp.lt.u32.totalorder %s1166_s13, %s1290_s5  ;;  %p809_p0 = scmp.lt.u32.totalorder %s807_s11, %s802_s14 }
  0x8f   : > { %p805_p1 = pnand %p804_p8, %p803_p12  ;;  %p811_p5 = scmp.lt.u32.totalorder %s802_s14, %s1166_s13 }
  0x90   : > { %p810_p2 = por %p809_p0, %p808_p13 }
  0x91   : > { %p806_p3 = pneg %p805_p1 }
  0x92   : > { %p812_p9 = por %p811_p5, %p810_p2 }
  0x94   : > { %p813_p4 = pnand %p812_p9, %p806_p3 }
  0x96   : > { %816 = shalt.err (!%p813_p4)
}
  0x97   : > { %s817_s18 = scalar_lea.vmem %s1172_s30, 256  ;;  %s919_s8 = smov [#allocation11]  }
  0x98   : > { %p818_p12 = scmp.ne.s32.totalorder %s1172_s30, %s817_s18  ;;  %s822_s10 = sshll.u32 %s919_s8, 4  ;;  %s823_s10 = int_to_ptr.vmem [resolvable:$false] %s822_s10 }
  0x99   : > { %s824_s12 = scalar_lea.vmem %s823_s10, 512  ;;  %p825_p6 = scmp.lt.s32.totalorder %s1172_s30, %s823_s10 }
  0x9a   : > { %p820_p1 = pnand %p818_p12, %p804_p8  ;;  %p826_p13 = scmp.lt.s32.totalorder %s824_s12, %s817_s18 }
  0x9c   : > { %p821_p10 = pneg %p820_p1  ;;  %p827_p0 = por %p826_p13, %p825_p6 }
  0x9e   : > { %p828_p2 = pnand %p827_p0, %p821_p10 }
  0xa0   : > { %831 = shalt.err (!%p828_p2)
}
  0xa1   : > { %603 = dma.hbm_to_vmem [thread:$0]  (!%p1168_p11), %s1166_s13, 256, %s1172_s30, %s1174_s9, %s915_s19, %s915_s19, %s916_s20  }
  0xa2   : > { %p1303_p8 = scmp.ne.s32.totalorder %s1295_s26, 0 }
  0xa3   : > { %p1304_p3 = scmp.eq.s32.totalorder (!%p1303_p8), %s980_s25, 0 }
  0xa4   : > { %288 = sbr.rel (%p1303_p8) target bundleno = 336 (0x150), region = 44 }
  0xab   : > { %877 = dma.done.wait (%p1304_p3), [#allocation3], 256   ;;  %p1305_p5 = pmov %p1304_p3 }
  0xac   : > { %p1306_p6 = pmov %p1304_p3 }
  0xad   : > { %879 = vsyncadd (%p1305_p5), [#allocation3], 4294967040 }
  0xae   : > { %881 = dma.done.wait (%p1306_p6), [#allocation6], 512   ;;  %p1307_p10 = pmov %p1304_p3 }
  0xaf   : > { %p1308_p9 = pmov %p1304_p3 }
  0xb0   : > { %883 = vsyncadd (%p1307_p10), [#allocation6], 4294966784 }
  0xb1   : > { %885 = dma.done.wait (%p1308_p9), [#allocation9], 512   ;;  %p1309_p11 = pmov %p1304_p3 }
  0xb2   : > { %s1220_s26 = sand.u32 1, %s902_s22  }
  0xb3   : > { %887 = vsyncadd (%p1309_p11), [#allocation9], 4294966784  ;;  %s551_s19 = sshll.u32 %s1220_s26, 4  ;;  %s311_s20 = scalar_lea.sflag [#allocation12], %s1220_s26 }
  0xb4   : > { %s314_s13 = scalar_lea.vmem [#allocation11], %s551_s19 }
  0xb5   : > { %889 = dma.done.wait (%p1148_p7), %s311_s20, 256  }
  0xb6   : > { %891 = vsyncadd (%p1148_p7), %s311_s20, 4294967040  ;;  %v343_v0 = vld [vmem:[%s314_s13] sm:$0xff]  ;;  %s920_s30 = smov 8   ;;  %s921_s7 = smov 120   ;;  %v344_v1 = vld [vmem:[%s314_s13 + $0x8] sm:$0xff]  ;;  %v367_v9 = vlaneseq }
  0xb7   : > { %345 = vrot.lane.b32.xlu0 %v343_v0, %s920_s30  ;;  %353 = vrot.lane.b32.xlu1 %v343_v0, %s921_s7  ;;  %v349_v2 = vld [vmem:[#allocation8] sm:$0xff]  ;;  %v357_v4 = vld [vmem:[#allocation10] sm:$0xff]  ;;  %v350_v7 = vld [vmem:[#allocation8 + $0x8] sm:$0xff]  ;;  %s559_s28 = sshll.u32 %s980_s25, 8  ;;  %s342_s9 = scalar_lea.vmem [#allocation13], %s551_s19 }
  0xb8   : > { %v358_v8 = vld [vmem:[#allocation10 + $0x8] sm:$0xff]  ;;  %v368_v16 = vshrl.u32 %v367_v9, 7  ;;  %v372_v22 = vld [vmem:[#allocation5] sm:$0xff]  ;;  %v373_v23 = vld [vmem:[#allocation5 + $0x8] sm:$0xff]  ;;  %s411_s14 = sshll.u32 %s342_s9, 4  ;;  %s1238_s18 = scalar_lea.hbm %s1291_s6, %s559_s28  ;;  %s1240_s14 = int_to_ptr.vmem [resolvable:$true] %s411_s14 }
  0xb9   : > { %v381_v26 = vld [vmem:[#allocation7] sm:$0xff]  ;;  %v382_v27 = vld [vmem:[#allocation7 + $0x8] sm:$0xff]  ;;  %s398_s25 = scalar_lea.sflag [#allocation4], %s1220_s26  ;;  %s832_s8 = scalar_lea.vmem %s1240_s14, 256 }
  0xba   : > { %vm369_vm0 = vcmp.lt.s32.totalorder %v368_v16, 1  ;;  %vm378_vm1 = vcmp.lt.s32.totalorder %v368_v16, 7  ;;  %v389_v38 = vld [vmem:[#allocation2] sm:$0xff]  ;;  %v390_v39 = vld [vmem:[#allocation2 + $0x8] sm:$0xff]  ;;  %p833_p7 = scmp.ne.s32.totalorder %s1240_s14, %s832_s8  ;;  %p1310_p4 = scmp.ne.s32.totalorder %s1300_s27, 0 }
  0xbb   : > { %347 = vrot.lane.b32.xlu0 %v344_v1, %s920_s30  ;;  %355 = vrot.lane.b32.xlu1 %v344_v1, %s921_s7  ;;  %s922_s10 = smov [#allocation13]  }
  0xbc   : > { %p834_p12 = pnand %p833_p7, %p1310_p4  ;;  %s836_s12 = sshll.u32 %s922_s10, 4  ;;  %s837_s12 = int_to_ptr.vmem [resolvable:$false] %s836_s12 }
  0xbd   : > { %s838_s19 = scalar_lea.vmem %s837_s12, 512  ;;  %p839_p13 = scmp.lt.s32.totalorder %s1240_s14, %s837_s12 }
  0xbe   : > { %p835_p1 = pneg %p834_p12  ;;  %p840_p0 = scmp.lt.s32.totalorder %s838_s19, %s832_s8 }
  0xc0   : > { %p841_p2 = por %p840_p0, %p839_p13 }
  0xc2   : > { %p842_p8 = pnand %p841_p2, %p835_p1 }
 0x129   : > { %v346_v3 = vpop.permute.xlu0 %345  ;;  %v354_v5 = vpop.permute.xlu1 %353 }
 0x12a   : > { %v351_v6 = vmul.f32 %v349_v2, %v346_v3  ;;  %v359_v11 = vmul.f32 %v357_v4, %v354_v5 }
 0x12c   : > { %v361_v10 = vadd.f32 %v351_v6, %v343_v0 }
 0x12d   : > { %v348_v12 = vpop.permute.xlu0 %347  ;;  %v356_v13 = vpop.permute.xlu1 %355 }
 0x12e   : > { %v352_v14 = vmul.f32 %v350_v7, %v348_v12  ;;  %v360_v15 = vmul.f32 %v358_v8, %v356_v13  ;;  %v363_v17 = vadd.f32 %v361_v10, %v359_v11 }
 0x130   : > { %v362_v18 = vadd.f32 %v352_v14, %v344_v1  ;;  %v365_v20 = vrot.slane %v363_v17, 7  ;;  %v376_v21 = vrot.slane %v363_v17, 1 }
 0x132   : > { %v364_v19 = vadd.f32 %v362_v18, %v360_v15 }
 0x134   : > { %v366_v24 = vrot.slane %v364_v19, 7  ;;  %v377_v25 = vrot.slane %v364_v19, 1 }
 0x136   : > { %v370_v28 = vsel %vm369_vm0, %v365_v20, %v366_v24  ;;  %v371_v29 = vsel %vm369_vm0, %v366_v24, %v365_v20  ;;  %v379_v30 = vsel %vm378_vm1, %v376_v21, %v377_v25  ;;  %v380_v31 = vsel %vm378_vm1, %v377_v25, %v376_v21 }
 0x137   : > { %v374_v32 = vmul.f32 %v372_v22, %v371_v29  ;;  %v375_v33 = vmul.f32 %v373_v23, %v370_v28  ;;  %v383_v34 = vmul.f32 %v381_v26, %v379_v30  ;;  %v384_v35 = vmul.f32 %v382_v27, %v380_v31 }
 0x139   : > { %v385_v36 = vadd.f32 %v374_v32, %v363_v17  ;;  %v386_v37 = vadd.f32 %v375_v33, %v364_v19 }
 0x13b   : > { %v387_v40 = vadd.f32 %v385_v36, %v383_v34  ;;  %v388_v41 = vadd.f32 %v386_v37, %v384_v35 }
 0x13d   : > { %v391_v42 = vmul.f32 %v389_v38, %v387_v40  ;;  %v392_v43 = vmul.f32 %v390_v39, %v388_v41 }
 0x13f   : > { %v393_v44 = vsub.f32 %v391_v42, %v343_v0  ;;  %v394_v45 = vsub.f32 %v392_v43, %v344_v1 }
 0x141   : > { %395 = vst [vmem:[%s342_s9] sm:$0xff] %v393_v44  ;;  %396 = vst [vmem:[%s342_s9 + $0x8] sm:$0xff] %v394_v45 }
 0x142   : > { %845 = shalt.err (!%p842_p8)
}
 0x143   : > { %s846_s20 = scalar_lea.hbm %s1238_s18, 256  ;;  %s850_s28 = scalar_lea.hbm %s1291_s6, 512 }
 0x144   : > { %p847_p3 = scmp.ne.s32.totalorder %s1238_s18, %s846_s20  ;;  %p851_p10 = scmp.lt.u32.totalorder %s1238_s18, %s1291_s6 }
 0x145   : > { %p852_p9 = scmp.lt.u32.totalorder %s850_s28, %s846_s20  ;;  %p854_p7 = scmp.lt.u32.totalorder %s846_s20, %s1238_s18 }
 0x146   : > { %p848_p5 = pnand %p847_p3, %p1310_p4 }
 0x147   : > { %p853_p11 = por %p852_p9, %p851_p10 }
 0x148   : > { %p849_p6 = pneg %p848_p5 }
 0x149   : > { %p855_p12 = por %p854_p7, %p853_p11 }
 0x14b   : > { %p856_p1 = pnand %p855_p12, %p849_p6 }
 0x14d   : > { %859 = shalt.err (!%p856_p1)
}
 0x14e   : > { %s923_s17 = smov 128  }
 0x14f   : > { %582 = dma.vmem_to_hbm [thread:$0]  (%p1310_p4), %s1240_s14, 256, %s1238_s18, %s398_s25, %s923_s17, %s923_s17, %s920_s30  }
 0x150 PF: > { %s426_s8 = sand.u32 1, %s898_s21   ;;  %p1311_p13 = scmp.ne.s32.totalorder %s1301_s29, 0 }
 0x151   : > { %p1312_p0 = scmp.ge.s32.totalorder %s910_s24, 2  ;;  %s427_s10 = scalar_lea.sflag [#allocation4], %s426_s8 }
 0x153   : > { %p605_p2 = pnand %p1312_p0, %p1311_p13 }
 0x155   : > { %893 = dma.done.wait (!%p605_p2), %s427_s10, 256  }
 0x156   : > { %895 = vsyncadd (!%p605_p2), %s427_s10, 4294967040  ;;  %p22_p8 = scmp.ge.s32.totalorder %s1132_s15, 4   ;;  %s1313_s21 = smov %s902_s22 }
 0x157   : > { %s1314_s22 = smov %s906_s23  ;;  %s1315_s23 = smov %s1144_s16 }
 0x158   : > { %s1316_s24 = smov %s1132_s15  ;;  %24 = sbr.rel (!%p22_p8) target bundleno = 8 (0x8), region = 110 }
 0x15f   :  { %432 = vsyncpa [#allocation3], 1 }
 0x160   :  { %434 = vsyncpa [#allocation3 + $0x1], 1 }
 0x161   :  { %435 = vsyncpa [#allocation6], 1 }
 0x162   :  { %436 = vsyncpa [#allocation9], 1 }
 0x163   :  { %437 = vsyncpa [#allocation12], 1 }
 0x164   :  { %439 = vsyncpa [#allocation12 + $0x1], 1 }
 0x165   :  { %440 = vsyncpa [#allocation4], 1 }
 0x166   :  { %442 = vsyncpa [#allocation4 + $0x1], 1 }

</bundles_post_ra>
